<compile_context>
chip_gen: v5e
topology: v5e:2x2
jax: 0.10.0
libtpu: 0.0.40
codegen_flags: <defaults>
</compile_context>

<pallas_src>
import functools

import jax
import jax.numpy as jnp
from jax.experimental import pallas as pl
from jax.experimental.pallas import tpu as pltpu


INPUT_SIZE = 2
HIDDEN_1 = 4
HIDDEN_2 = 8
BN_EPS = 1e-5

_LANES = 128
_SUBLANES = 8
_MIN_TILE = _LANES * _SUBLANES  # 1024 batch elements per (8,128) slab


def _mlp_kernel(x_ref, w1_ref, b1_ref, w2_ref, b2_ref, w3_ref, b3_ref, o_ref):
    """Fused 3-layer MLP forward for one lane-dense batch slab.

    x_ref : VMEM (INPUT_SIZE, TBr, 128)  -- feature-major, batch on (sublane, lane)
    w1_ref: SMEM (INPUT_SIZE*HIDDEN_1,)  row-major flat (in, out), BN1 folded
    b1_ref: SMEM (HIDDEN_1,)
    w2_ref: SMEM (HIDDEN_1*HIDDEN_2,)    row-major flat (in, out), BN2 folded
    b2_ref: SMEM (HIDDEN_2,)
    w3_ref: SMEM (HIDDEN_2,)
    b3_ref: SMEM (1,)
    o_ref : VMEM (TBr, 128)
    """
    # Dense (TBr, 128) slabs, one per input feature.
    x0 = x_ref[0]
    x1 = x_ref[1]

    # Layer 1: 2 -> 4 (BN1 folded into weights/bias), ReLU.  Unrolled VPU FMAs.
    h1 = []
    for j in range(HIDDEN_1):
        v = x0 * w1_ref[j] + x1 * w1_ref[HIDDEN_1 + j] + b1_ref[j]
        h1.append(jnp.maximum(v, 0.0))

    # Layer 2: 4 -> 8 (BN2 folded), ReLU.
    h2 = []
    for j in range(HIDDEN_2):
        acc = h1[0] * w2_ref[j] + b2_ref[j]
        for k in range(1, HIDDEN_1):
            acc = acc + h1[k] * w2_ref[k * HIDDEN_2 + j]
        h2.append(jnp.maximum(acc, 0.0))

    # Final layer: 8 -> 1.
    y = h2[0] * w3_ref[0] + b3_ref[0]
    for k in range(1, HIDDEN_2):
        y = y + h2[k] * w3_ref[k]
    o_ref[...] = y.astype(o_ref.dtype)


def nn_surrogate_forward(x, params, *, tile_b=8192):
    """Runs the NNSurrogate forward pass with a Pallas TPU kernel.

    x: (B, INPUT_SIZE) float array (any B; padded internally).
    params: dict of flattened BN-folded weights/biases (see init_params).
    tile_b: batch elements per grid step; must be a multiple of 1024 (8x128).
    Returns: (B, 1) float32.
    """
    assert tile_b % _MIN_TILE == 0 and tile_b >= _MIN_TILE
    x = x.astype(jnp.float32)
    B = x.shape[0]

    # Pad batch to a multiple of the tile and lay it out lane-dense:
    # (B, 2) -> (2, Bp) -> (2, Bp/128, 128).  Pure layout plumbing (fused by XLA
    # into one pass when this function is jitted).
    Bp = ((B + tile_b - 1) // tile_b) * tile_b
    xt = jnp.transpose(x)                                   # (2, B)
    if Bp != B:
        xt = jnp.pad(xt, ((0, 0), (0, Bp - B)))
    rows = Bp // _LANES
    xs = xt.reshape(INPUT_SIZE, rows, _LANES)

    tbr = tile_b // _LANES          # sublane-rows per grid step (multiple of 8)
    grid = (rows // tbr,)

    smem = pl.BlockSpec(memory_space=pltpu.MemorySpace.SMEM)

    y = pl.pallas_call(
        _mlp_kernel,
        out_shape=jax.ShapeDtypeStruct((rows, _LANES), jnp.float32),
        grid_spec=pl.GridSpec(
            grid=grid,
            in_specs=[
                pl.BlockSpec((INPUT_SIZE, tbr, _LANES), lambda i: (0, i, 0)),
                smem, smem,   # w1, b1
                smem, smem,   # w2, b2
                smem, smem,   # w3, b3
            ],
            out_specs=pl.BlockSpec((tbr, _LANES), lambda i: (i, 0)),
        ),
        compiler_params=pltpu.CompilerParams(
            dimension_semantics=("parallel",)),
    )(xs,
      params["w1"], params["b1"],
      params["w2"], params["b2"],
      params["w3"], params["b3"])

    return y.reshape(Bp)[:B].reshape(B, 1)


def init_params(key):
    """Deterministic parameter init matching the PyTorch module's shapes.

    nn.Linear weights are (out, in); BatchNorm1d has gamma/beta/running stats
    of size (features,).  BN (eval mode) is folded exactly into the preceding
    Linear: y = (x @ W.T + b - mean) * gamma / sqrt(var + eps) + beta.
    Weights are returned flattened (row-major over (in, out)) for SMEM use.
    """
    ks = jax.random.split(key, 14)

    def linear(kw, kb, fan_in, fan_out):
        bound = 1.0 / jnp.sqrt(fan_in)
        w = jax.random.uniform(kw, (fan_out, fan_in), jnp.float32, -bound, bound)
        b = jax.random.uniform(kb, (fan_out,), jnp.float32, -bound, bound)
        return w, b

    w1, b1 = linear(ks[0], ks[1], INPUT_SIZE, HIDDEN_1)
    w2, b2 = linear(ks[2], ks[3], HIDDEN_1, HIDDEN_2)
    w3, b3 = linear(ks[4], ks[5], HIDDEN_2, 1)

    def bn(kg, kb, km, kv, n):
        gamma = 1.0 + 0.1 * jax.random.normal(kg, (n,), jnp.float32)
        beta = 0.1 * jax.random.normal(kb, (n,), jnp.float32)
        mean = 0.1 * jax.random.normal(km, (n,), jnp.float32)
        var = 1.0 + 0.1 * jax.random.uniform(kv, (n,), jnp.float32)
        return gamma, beta, mean, var

    g1, be1, m1, v1 = bn(ks[6], ks[7], ks[8], ks[9], HIDDEN_1)
    g2, be2, m2, v2 = bn(ks[10], ks[11], ks[12], ks[13], HIDDEN_2)

    def fold(w, b, gamma, beta, mean, var):
        scale = gamma / jnp.sqrt(var + BN_EPS)          # (out,)
        w_eff = w.T * scale[None, :]                    # (in, out)
        b_eff = (b - mean) * scale + beta               # (out,)
        return w_eff, b_eff

    w1e, b1e = fold(w1, b1, g1, be1, m1, v1)
    w2e, b2e = fold(w2, b2, g2, be2, m2, v2)

    return {
        "w1": w1e.reshape(-1), "b1": b1e,                # (8,),  (4,)
        "w2": w2e.reshape(-1), "b2": b2e,                # (32,), (8,)
        "w3": w3.T.reshape(-1), "b3": b3,                # (8,),  (1,)
    }


def reference_forward(x, params):
    """Pure-JAX reference of the same (BN-folded) forward pass.

    Uses explicit f32 elementwise multiply + sum (no MXU dot) so the reference
    matches the kernel's f32 VPU arithmetic up to reassociation.
    """
    x = x.astype(jnp.float32)
    w1 = params["w1"].reshape(INPUT_SIZE, HIDDEN_1)
    w2 = params["w2"].reshape(HIDDEN_1, HIDDEN_2)
    w3 = params["w3"].reshape(HIDDEN_2, 1)
    h1 = jnp.maximum(
        jnp.sum(x[:, :, None] * w1[None, :, :], axis=1) + params["b1"][None, :], 0.0)
    h2 = jnp.maximum(
        jnp.sum(h1[:, :, None] * w2[None, :, :], axis=1) + params["b2"][None, :], 0.0)
    y = jnp.sum(h2[:, :, None] * w3[None, :, :], axis=1) + params["b3"][None, :]
    return y


if __name__ == "__main__":
    key = jax.random.PRNGKey(0)
    k_param, k_x = jax.random.split(key)

    params = init_params(k_param)

    # Deliberately not tile-aligned; wrapper pads to 2048 -> a 2-step
    # "parallel" grid (both TensorCores active on multi-core chips).
    B = 2000
    x = jax.random.normal(k_x, (B, INPUT_SIZE), jnp.float32)

    fwd = jax.jit(functools.partial(nn_surrogate_forward, tile_b=1024))
    y = fwd(x, params)
    y = jax.block_until_ready(y)

    y_ref = reference_forward(x, params)
    assert y.shape == (B, 1)
    assert jnp.allclose(y, y_ref, atol=1e-5, rtol=1e-4)

    print("KERNEL_OK")
</pallas_src>

<mosaic_0001>
module attributes {stable_mosaic.version = 11 : i64} {
  func.func @_mlp_kernel(%arg0: i32, %arg1: memref<2x8x128xf32, #tpu.memory_space<vmem>>, %arg2: memref<8xf32, #tpu.memory_space<smem>>, %arg3: memref<4xf32, #tpu.memory_space<smem>>, %arg4: memref<32xf32, #tpu.memory_space<smem>>, %arg5: memref<8xf32, #tpu.memory_space<smem>>, %arg6: memref<8xf32, #tpu.memory_space<smem>>, %arg7: memref<1xf32, #tpu.memory_space<smem>>, %arg8: memref<8x128xf32, #tpu.memory_space<vmem>>) attributes {dimension_semantics = [#tpu.dimension_semantics<parallel>], iteration_bounds = array<i64: 2>, scalar_prefetch = 0 : i64, scratch_operands = 0 : i64, tpu.core_type = #tpu.core_type<tc>, window_params = [{transform_indices = @transform_0, window_bounds = array<i64: 2, 8, 128>}, {transform_indices = @transform_1, window_bounds = array<i64: 8>}, {transform_indices = @transform_2, window_bounds = array<i64: 4>}, {transform_indices = @transform_3, window_bounds = array<i64: 32>}, {transform_indices = @transform_4, window_bounds = array<i64: 8>}, {transform_indices = @transform_5, window_bounds = array<i64: 8>}, {transform_indices = @transform_6, window_bounds = array<i64: 1>}, {transform_indices = @transform_7, window_bounds = array<i64: 8, 128>}]} {
    %c0 = arith.constant 0 : index
    %c0_0 = arith.constant 0 : index
    %c0_1 = arith.constant 0 : index
    %0 = vector.load %arg1[%c0, %c0_0, %c0_1] : memref<2x8x128xf32, #tpu.memory_space<vmem>>, vector<1x8x128xf32>
    %1 = vector.shape_cast %0 : vector<1x8x128xf32> to vector<8x128xf32>
    %c1 = arith.constant 1 : index
    %c0_2 = arith.constant 0 : index
    %c0_3 = arith.constant 0 : index
    %2 = vector.load %arg1[%c1, %c0_2, %c0_3] : memref<2x8x128xf32, #tpu.memory_space<vmem>>, vector<1x8x128xf32>
    %3 = vector.shape_cast %2 : vector<1x8x128xf32> to vector<8x128xf32>
    %c0_4 = arith.constant 0 : index
    %4 = memref.load %arg2[%c0_4] : memref<8xf32, #tpu.memory_space<smem>>
    %5 = vector.broadcast %4 : f32 to vector<8x128xf32>
    %6 = arith.mulf %1, %5 : vector<8x128xf32>
    %c4 = arith.constant 4 : index
    %7 = memref.load %arg2[%c4] : memref<8xf32, #tpu.memory_space<smem>>
    %8 = vector.broadcast %7 : f32 to vector<8x128xf32>
    %9 = arith.mulf %3, %8 : vector<8x128xf32>
    %10 = arith.addf %6, %9 : vector<8x128xf32>
    %c0_5 = arith.constant 0 : index
    %11 = memref.load %arg3[%c0_5] : memref<4xf32, #tpu.memory_space<smem>>
    %12 = vector.broadcast %11 : f32 to vector<8x128xf32>
    %13 = arith.addf %10, %12 : vector<8x128xf32>
    %cst = arith.constant 0.000000e+00 : f32
    %14 = vector.broadcast %cst : f32 to vector<8x128xf32>
    %15 = arith.maximumf %13, %14 : vector<8x128xf32>
    %c1_6 = arith.constant 1 : index
    %16 = memref.load %arg2[%c1_6] : memref<8xf32, #tpu.memory_space<smem>>
    %17 = vector.broadcast %16 : f32 to vector<8x128xf32>
    %18 = arith.mulf %1, %17 : vector<8x128xf32>
    %c5 = arith.constant 5 : index
    %19 = memref.load %arg2[%c5] : memref<8xf32, #tpu.memory_space<smem>>
    %20 = vector.broadcast %19 : f32 to vector<8x128xf32>
    %21 = arith.mulf %3, %20 : vector<8x128xf32>
    %22 = arith.addf %18, %21 : vector<8x128xf32>
    %c1_7 = arith.constant 1 : index
    %23 = memref.load %arg3[%c1_7] : memref<4xf32, #tpu.memory_space<smem>>
    %24 = vector.broadcast %23 : f32 to vector<8x128xf32>
    %25 = arith.addf %22, %24 : vector<8x128xf32>
    %cst_8 = arith.constant 0.000000e+00 : f32
    %26 = vector.broadcast %cst_8 : f32 to vector<8x128xf32>
    %27 = arith.maximumf %25, %26 : vector<8x128xf32>
    %c2 = arith.constant 2 : index
    %28 = memref.load %arg2[%c2] : memref<8xf32, #tpu.memory_space<smem>>
    %29 = vector.broadcast %28 : f32 to vector<8x128xf32>
    %30 = arith.mulf %1, %29 : vector<8x128xf32>
    %c6 = arith.constant 6 : index
    %31 = memref.load %arg2[%c6] : memref<8xf32, #tpu.memory_space<smem>>
    %32 = vector.broadcast %31 : f32 to vector<8x128xf32>
    %33 = arith.mulf %3, %32 : vector<8x128xf32>
    %34 = arith.addf %30, %33 : vector<8x128xf32>
    %c2_9 = arith.constant 2 : index
    %35 = memref.load %arg3[%c2_9] : memref<4xf32, #tpu.memory_space<smem>>
    %36 = vector.broadcast %35 : f32 to vector<8x128xf32>
    %37 = arith.addf %34, %36 : vector<8x128xf32>
    %cst_10 = arith.constant 0.000000e+00 : f32
    %38 = vector.broadcast %cst_10 : f32 to vector<8x128xf32>
    %39 = arith.maximumf %37, %38 : vector<8x128xf32>
    %c3 = arith.constant 3 : index
    %40 = memref.load %arg2[%c3] : memref<8xf32, #tpu.memory_space<smem>>
    %41 = vector.broadcast %40 : f32 to vector<8x128xf32>
    %42 = arith.mulf %1, %41 : vector<8x128xf32>
    %c7 = arith.constant 7 : index
    %43 = memref.load %arg2[%c7] : memref<8xf32, #tpu.memory_space<smem>>
    %44 = vector.broadcast %43 : f32 to vector<8x128xf32>
    %45 = arith.mulf %3, %44 : vector<8x128xf32>
    %46 = arith.addf %42, %45 : vector<8x128xf32>
    %c3_11 = arith.constant 3 : index
    %47 = memref.load %arg3[%c3_11] : memref<4xf32, #tpu.memory_space<smem>>
    %48 = vector.broadcast %47 : f32 to vector<8x128xf32>
    %49 = arith.addf %46, %48 : vector<8x128xf32>
    %cst_12 = arith.constant 0.000000e+00 : f32
    %50 = vector.broadcast %cst_12 : f32 to vector<8x128xf32>
    %51 = arith.maximumf %49, %50 : vector<8x128xf32>
    %c0_13 = arith.constant 0 : index
    %52 = memref.load %arg4[%c0_13] : memref<32xf32, #tpu.memory_space<smem>>
    %53 = vector.broadcast %52 : f32 to vector<8x128xf32>
    %54 = arith.mulf %15, %53 : vector<8x128xf32>
    %c0_14 = arith.constant 0 : index
    %55 = memref.load %arg5[%c0_14] : memref<8xf32, #tpu.memory_space<smem>>
    %56 = vector.broadcast %55 : f32 to vector<8x128xf32>
    %57 = arith.addf %54, %56 : vector<8x128xf32>
    %c8 = arith.constant 8 : index
    %58 = memref.load %arg4[%c8] : memref<32xf32, #tpu.memory_space<smem>>
    %59 = vector.broadcast %58 : f32 to vector<8x128xf32>
    %60 = arith.mulf %27, %59 : vector<8x128xf32>
    %61 = arith.addf %57, %60 : vector<8x128xf32>
    %c16 = arith.constant 16 : index
    %62 = memref.load %arg4[%c16] : memref<32xf32, #tpu.memory_space<smem>>
    %63 = vector.broadcast %62 : f32 to vector<8x128xf32>
    %64 = arith.mulf %39, %63 : vector<8x128xf32>
    %65 = arith.addf %61, %64 : vector<8x128xf32>
    %c24 = arith.constant 24 : index
    %66 = memref.load %arg4[%c24] : memref<32xf32, #tpu.memory_space<smem>>
    %67 = vector.broadcast %66 : f32 to vector<8x128xf32>
    %68 = arith.mulf %51, %67 : vector<8x128xf32>
    %69 = arith.addf %65, %68 : vector<8x128xf32>
    %cst_15 = arith.constant 0.000000e+00 : f32
    %70 = vector.broadcast %cst_15 : f32 to vector<8x128xf32>
    %71 = arith.maximumf %69, %70 : vector<8x128xf32>
    %c1_16 = arith.constant 1 : index
    %72 = memref.load %arg4[%c1_16] : memref<32xf32, #tpu.memory_space<smem>>
    %73 = vector.broadcast %72 : f32 to vector<8x128xf32>
    %74 = arith.mulf %15, %73 : vector<8x128xf32>
    %c1_17 = arith.constant 1 : index
    %75 = memref.load %arg5[%c1_17] : memref<8xf32, #tpu.memory_space<smem>>
    %76 = vector.broadcast %75 : f32 to vector<8x128xf32>
    %77 = arith.addf %74, %76 : vector<8x128xf32>
    %c9 = arith.constant 9 : index
    %78 = memref.load %arg4[%c9] : memref<32xf32, #tpu.memory_space<smem>>
    %79 = vector.broadcast %78 : f32 to vector<8x128xf32>
    %80 = arith.mulf %27, %79 : vector<8x128xf32>
    %81 = arith.addf %77, %80 : vector<8x128xf32>
    %c17 = arith.constant 17 : index
    %82 = memref.load %arg4[%c17] : memref<32xf32, #tpu.memory_space<smem>>
    %83 = vector.broadcast %82 : f32 to vector<8x128xf32>
    %84 = arith.mulf %39, %83 : vector<8x128xf32>
    %85 = arith.addf %81, %84 : vector<8x128xf32>
    %c25 = arith.constant 25 : index
    %86 = memref.load %arg4[%c25] : memref<32xf32, #tpu.memory_space<smem>>
    %87 = vector.broadcast %86 : f32 to vector<8x128xf32>
    %88 = arith.mulf %51, %87 : vector<8x128xf32>
    %89 = arith.addf %85, %88 : vector<8x128xf32>
    %cst_18 = arith.constant 0.000000e+00 : f32
    %90 = vector.broadcast %cst_18 : f32 to vector<8x128xf32>
    %91 = arith.maximumf %89, %90 : vector<8x128xf32>
    %c2_19 = arith.constant 2 : index
    %92 = memref.load %arg4[%c2_19] : memref<32xf32, #tpu.memory_space<smem>>
    %93 = vector.broadcast %92 : f32 to vector<8x128xf32>
    %94 = arith.mulf %15, %93 : vector<8x128xf32>
    %c2_20 = arith.constant 2 : index
    %95 = memref.load %arg5[%c2_20] : memref<8xf32, #tpu.memory_space<smem>>
    %96 = vector.broadcast %95 : f32 to vector<8x128xf32>
    %97 = arith.addf %94, %96 : vector<8x128xf32>
    %c10 = arith.constant 10 : index
    %98 = memref.load %arg4[%c10] : memref<32xf32, #tpu.memory_space<smem>>
    %99 = vector.broadcast %98 : f32 to vector<8x128xf32>
    %100 = arith.mulf %27, %99 : vector<8x128xf32>
    %101 = arith.addf %97, %100 : vector<8x128xf32>
    %c18 = arith.constant 18 : index
    %102 = memref.load %arg4[%c18] : memref<32xf32, #tpu.memory_space<smem>>
    %103 = vector.broadcast %102 : f32 to vector<8x128xf32>
    %104 = arith.mulf %39, %103 : vector<8x128xf32>
    %105 = arith.addf %101, %104 : vector<8x128xf32>
    %c26 = arith.constant 26 : index
    %106 = memref.load %arg4[%c26] : memref<32xf32, #tpu.memory_space<smem>>
    %107 = vector.broadcast %106 : f32 to vector<8x128xf32>
    %108 = arith.mulf %51, %107 : vector<8x128xf32>
    %109 = arith.addf %105, %108 : vector<8x128xf32>
    %cst_21 = arith.constant 0.000000e+00 : f32
    %110 = vector.broadcast %cst_21 : f32 to vector<8x128xf32>
    %111 = arith.maximumf %109, %110 : vector<8x128xf32>
    %c3_22 = arith.constant 3 : index
    %112 = memref.load %arg4[%c3_22] : memref<32xf32, #tpu.memory_space<smem>>
    %113 = vector.broadcast %112 : f32 to vector<8x128xf32>
    %114 = arith.mulf %15, %113 : vector<8x128xf32>
    %c3_23 = arith.constant 3 : index
    %115 = memref.load %arg5[%c3_23] : memref<8xf32, #tpu.memory_space<smem>>
    %116 = vector.broadcast %115 : f32 to vector<8x128xf32>
    %117 = arith.addf %114, %116 : vector<8x128xf32>
    %c11 = arith.constant 11 : index
    %118 = memref.load %arg4[%c11] : memref<32xf32, #tpu.memory_space<smem>>
    %119 = vector.broadcast %118 : f32 to vector<8x128xf32>
    %120 = arith.mulf %27, %119 : vector<8x128xf32>
    %121 = arith.addf %117, %120 : vector<8x128xf32>
    %c19 = arith.constant 19 : index
    %122 = memref.load %arg4[%c19] : memref<32xf32, #tpu.memory_space<smem>>
    %123 = vector.broadcast %122 : f32 to vector<8x128xf32>
    %124 = arith.mulf %39, %123 : vector<8x128xf32>
    %125 = arith.addf %121, %124 : vector<8x128xf32>
    %c27 = arith.constant 27 : index
    %126 = memref.load %arg4[%c27] : memref<32xf32, #tpu.memory_space<smem>>
    %127 = vector.broadcast %126 : f32 to vector<8x128xf32>
    %128 = arith.mulf %51, %127 : vector<8x128xf32>
    %129 = arith.addf %125, %128 : vector<8x128xf32>
    %cst_24 = arith.constant 0.000000e+00 : f32
    %130 = vector.broadcast %cst_24 : f32 to vector<8x128xf32>
    %131 = arith.maximumf %129, %130 : vector<8x128xf32>
    %c4_25 = arith.constant 4 : index
    %132 = memref.load %arg4[%c4_25] : memref<32xf32, #tpu.memory_space<smem>>
    %133 = vector.broadcast %132 : f32 to vector<8x128xf32>
    %134 = arith.mulf %15, %133 : vector<8x128xf32>
    %c4_26 = arith.constant 4 : index
    %135 = memref.load %arg5[%c4_26] : memref<8xf32, #tpu.memory_space<smem>>
    %136 = vector.broadcast %135 : f32 to vector<8x128xf32>
    %137 = arith.addf %134, %136 : vector<8x128xf32>
    %c12 = arith.constant 12 : index
    %138 = memref.load %arg4[%c12] : memref<32xf32, #tpu.memory_space<smem>>
    %139 = vector.broadcast %138 : f32 to vector<8x128xf32>
    %140 = arith.mulf %27, %139 : vector<8x128xf32>
    %141 = arith.addf %137, %140 : vector<8x128xf32>
    %c20 = arith.constant 20 : index
    %142 = memref.load %arg4[%c20] : memref<32xf32, #tpu.memory_space<smem>>
    %143 = vector.broadcast %142 : f32 to vector<8x128xf32>
    %144 = arith.mulf %39, %143 : vector<8x128xf32>
    %145 = arith.addf %141, %144 : vector<8x128xf32>
    %c28 = arith.constant 28 : index
    %146 = memref.load %arg4[%c28] : memref<32xf32, #tpu.memory_space<smem>>
    %147 = vector.broadcast %146 : f32 to vector<8x128xf32>
    %148 = arith.mulf %51, %147 : vector<8x128xf32>
    %149 = arith.addf %145, %148 : vector<8x128xf32>
    %cst_27 = arith.constant 0.000000e+00 : f32
    %150 = vector.broadcast %cst_27 : f32 to vector<8x128xf32>
    %151 = arith.maximumf %149, %150 : vector<8x128xf32>
    %c5_28 = arith.constant 5 : index
    %152 = memref.load %arg4[%c5_28] : memref<32xf32, #tpu.memory_space<smem>>
    %153 = vector.broadcast %152 : f32 to vector<8x128xf32>
    %154 = arith.mulf %15, %153 : vector<8x128xf32>
    %c5_29 = arith.constant 5 : index
    %155 = memref.load %arg5[%c5_29] : memref<8xf32, #tpu.memory_space<smem>>
    %156 = vector.broadcast %155 : f32 to vector<8x128xf32>
    %157 = arith.addf %154, %156 : vector<8x128xf32>
    %c13 = arith.constant 13 : index
    %158 = memref.load %arg4[%c13] : memref<32xf32, #tpu.memory_space<smem>>
    %159 = vector.broadcast %158 : f32 to vector<8x128xf32>
    %160 = arith.mulf %27, %159 : vector<8x128xf32>
    %161 = arith.addf %157, %160 : vector<8x128xf32>
    %c21 = arith.constant 21 : index
    %162 = memref.load %arg4[%c21] : memref<32xf32, #tpu.memory_space<smem>>
    %163 = vector.broadcast %162 : f32 to vector<8x128xf32>
    %164 = arith.mulf %39, %163 : vector<8x128xf32>
    %165 = arith.addf %161, %164 : vector<8x128xf32>
    %c29 = arith.constant 29 : index
    %166 = memref.load %arg4[%c29] : memref<32xf32, #tpu.memory_space<smem>>
    %167 = vector.broadcast %166 : f32 to vector<8x128xf32>
    %168 = arith.mulf %51, %167 : vector<8x128xf32>
    %169 = arith.addf %165, %168 : vector<8x128xf32>
    %cst_30 = arith.constant 0.000000e+00 : f32
    %170 = vector.broadcast %cst_30 : f32 to vector<8x128xf32>
    %171 = arith.maximumf %169, %170 : vector<8x128xf32>
    %c6_31 = arith.constant 6 : index
    %172 = memref.load %arg4[%c6_31] : memref<32xf32, #tpu.memory_space<smem>>
    %173 = vector.broadcast %172 : f32 to vector<8x128xf32>
    %174 = arith.mulf %15, %173 : vector<8x128xf32>
    %c6_32 = arith.constant 6 : index
    %175 = memref.load %arg5[%c6_32] : memref<8xf32, #tpu.memory_space<smem>>
    %176 = vector.broadcast %175 : f32 to vector<8x128xf32>
    %177 = arith.addf %174, %176 : vector<8x128xf32>
    %c14 = arith.constant 14 : index
    %178 = memref.load %arg4[%c14] : memref<32xf32, #tpu.memory_space<smem>>
    %179 = vector.broadcast %178 : f32 to vector<8x128xf32>
    %180 = arith.mulf %27, %179 : vector<8x128xf32>
    %181 = arith.addf %177, %180 : vector<8x128xf32>
    %c22 = arith.constant 22 : index
    %182 = memref.load %arg4[%c22] : memref<32xf32, #tpu.memory_space<smem>>
    %183 = vector.broadcast %182 : f32 to vector<8x128xf32>
    %184 = arith.mulf %39, %183 : vector<8x128xf32>
    %185 = arith.addf %181, %184 : vector<8x128xf32>
    %c30 = arith.constant 30 : index
    %186 = memref.load %arg4[%c30] : memref<32xf32, #tpu.memory_space<smem>>
    %187 = vector.broadcast %186 : f32 to vector<8x128xf32>
    %188 = arith.mulf %51, %187 : vector<8x128xf32>
    %189 = arith.addf %185, %188 : vector<8x128xf32>
    %cst_33 = arith.constant 0.000000e+00 : f32
    %190 = vector.broadcast %cst_33 : f32 to vector<8x128xf32>
    %191 = arith.maximumf %189, %190 : vector<8x128xf32>
    %c7_34 = arith.constant 7 : index
    %192 = memref.load %arg4[%c7_34] : memref<32xf32, #tpu.memory_space<smem>>
    %193 = vector.broadcast %192 : f32 to vector<8x128xf32>
    %194 = arith.mulf %15, %193 : vector<8x128xf32>
    %c7_35 = arith.constant 7 : index
    %195 = memref.load %arg5[%c7_35] : memref<8xf32, #tpu.memory_space<smem>>
    %196 = vector.broadcast %195 : f32 to vector<8x128xf32>
    %197 = arith.addf %194, %196 : vector<8x128xf32>
    %c15 = arith.constant 15 : index
    %198 = memref.load %arg4[%c15] : memref<32xf32, #tpu.memory_space<smem>>
    %199 = vector.broadcast %198 : f32 to vector<8x128xf32>
    %200 = arith.mulf %27, %199 : vector<8x128xf32>
    %201 = arith.addf %197, %200 : vector<8x128xf32>
    %c23 = arith.constant 23 : index
    %202 = memref.load %arg4[%c23] : memref<32xf32, #tpu.memory_space<smem>>
    %203 = vector.broadcast %202 : f32 to vector<8x128xf32>
    %204 = arith.mulf %39, %203 : vector<8x128xf32>
    %205 = arith.addf %201, %204 : vector<8x128xf32>
    %c31 = arith.constant 31 : index
    %206 = memref.load %arg4[%c31] : memref<32xf32, #tpu.memory_space<smem>>
    %207 = vector.broadcast %206 : f32 to vector<8x128xf32>
    %208 = arith.mulf %51, %207 : vector<8x128xf32>
    %209 = arith.addf %205, %208 : vector<8x128xf32>
    %cst_36 = arith.constant 0.000000e+00 : f32
    %210 = vector.broadcast %cst_36 : f32 to vector<8x128xf32>
    %211 = arith.maximumf %209, %210 : vector<8x128xf32>
    %c0_37 = arith.constant 0 : index
    %212 = memref.load %arg6[%c0_37] : memref<8xf32, #tpu.memory_space<smem>>
    %213 = vector.broadcast %212 : f32 to vector<8x128xf32>
    %214 = arith.mulf %71, %213 : vector<8x128xf32>
    %c0_38 = arith.constant 0 : index
    %215 = memref.load %arg7[%c0_38] : memref<1xf32, #tpu.memory_space<smem>>
    %216 = vector.broadcast %215 : f32 to vector<8x128xf32>
    %217 = arith.addf %214, %216 : vector<8x128xf32>
    %c1_39 = arith.constant 1 : index
    %218 = memref.load %arg6[%c1_39] : memref<8xf32, #tpu.memory_space<smem>>
    %219 = vector.broadcast %218 : f32 to vector<8x128xf32>
    %220 = arith.mulf %91, %219 : vector<8x128xf32>
    %221 = arith.addf %217, %220 : vector<8x128xf32>
    %c2_40 = arith.constant 2 : index
    %222 = memref.load %arg6[%c2_40] : memref<8xf32, #tpu.memory_space<smem>>
    %223 = vector.broadcast %222 : f32 to vector<8x128xf32>
    %224 = arith.mulf %111, %223 : vector<8x128xf32>
    %225 = arith.addf %221, %224 : vector<8x128xf32>
    %c3_41 = arith.constant 3 : index
    %226 = memref.load %arg6[%c3_41] : memref<8xf32, #tpu.memory_space<smem>>
    %227 = vector.broadcast %226 : f32 to vector<8x128xf32>
    %228 = arith.mulf %131, %227 : vector<8x128xf32>
    %229 = arith.addf %225, %228 : vector<8x128xf32>
    %c4_42 = arith.constant 4 : index
    %230 = memref.load %arg6[%c4_42] : memref<8xf32, #tpu.memory_space<smem>>
    %231 = vector.broadcast %230 : f32 to vector<8x128xf32>
    %232 = arith.mulf %151, %231 : vector<8x128xf32>
    %233 = arith.addf %229, %232 : vector<8x128xf32>
    %c5_43 = arith.constant 5 : index
    %234 = memref.load %arg6[%c5_43] : memref<8xf32, #tpu.memory_space<smem>>
    %235 = vector.broadcast %234 : f32 to vector<8x128xf32>
    %236 = arith.mulf %171, %235 : vector<8x128xf32>
    %237 = arith.addf %233, %236 : vector<8x128xf32>
    %c6_44 = arith.constant 6 : index
    %238 = memref.load %arg6[%c6_44] : memref<8xf32, #tpu.memory_space<smem>>
    %239 = vector.broadcast %238 : f32 to vector<8x128xf32>
    %240 = arith.mulf %191, %239 : vector<8x128xf32>
    %241 = arith.addf %237, %240 : vector<8x128xf32>
    %c7_45 = arith.constant 7 : index
    %242 = memref.load %arg6[%c7_45] : memref<8xf32, #tpu.memory_space<smem>>
    %243 = vector.broadcast %242 : f32 to vector<8x128xf32>
    %244 = arith.mulf %211, %243 : vector<8x128xf32>
    %245 = arith.addf %241, %244 : vector<8x128xf32>
    %c0_46 = arith.constant 0 : index
    %c0_47 = arith.constant 0 : index
    %246 = vector.load %arg8[%c0_46, %c0_47] : memref<8x128xf32, #tpu.memory_space<vmem>>, vector<8x128xf32>
    tpu.vector_store %arg8[%c0_46, %c0_47], %245 {strides = array<i32>} : memref<8x128xf32, #tpu.memory_space<vmem>>, vector<8x128xf32>,
    return
  }
  func.func @transform_0(%arg0: i32) -> (i32, i32, i32) {
    %c0_i32 = arith.constant 0 : i32
    %c0_i32_0 = arith.constant 0 : i32
    %c0_i32_1 = arith.constant 0 : i32
    return %c0_i32, %arg0, %c0_i32_0 : i32, i32, i32
  }
  func.func @transform_1(%arg0: i32) -> i32 {
    %c0_i32 = arith.constant 0 : i32
    %c0_i32_0 = arith.constant 0 : i32
    return %c0_i32 : i32
  }
  func.func @transform_2(%arg0: i32) -> i32 {
    %c0_i32 = arith.constant 0 : i32
    %c0_i32_0 = arith.constant 0 : i32
    return %c0_i32 : i32
  }
  func.func @transform_3(%arg0: i32) -> i32 {
    %c0_i32 = arith.constant 0 : i32
    %c0_i32_0 = arith.constant 0 : i32
    return %c0_i32 : i32
  }
  func.func @transform_4(%arg0: i32) -> i32 {
    %c0_i32 = arith.constant 0 : i32
    %c0_i32_0 = arith.constant 0 : i32
    return %c0_i32 : i32
  }
  func.func @transform_5(%arg0: i32) -> i32 {
    %c0_i32 = arith.constant 0 : i32
    %c0_i32_0 = arith.constant 0 : i32
    return %c0_i32 : i32
  }
  func.func @transform_6(%arg0: i32) -> i32 {
    %c0_i32 = arith.constant 0 : i32
    %c0_i32_0 = arith.constant 0 : i32
    return %c0_i32 : i32
  }
  func.func @transform_7(%arg0: i32) -> (i32, i32) {
    %c0_i32 = arith.constant 0 : i32
    %c0_i32_0 = arith.constant 0 : i32
    return %arg0, %c0_i32 : i32, i32
  }
}

</mosaic_0001>

<bundles_post_ra>
// kernel: nn_surrogate_forward.1
= control target key start
LH: loop header
LB: loop body
LE: loop exit
PB: predicated region body
PF: predicated region fallthrough
CT: control target
= control target key end

     0   :  { %s1459_s0 = inlined_call_operand.vmem [shape: f32[2,16,128], index: 0, kind: input, shape index: {}]   ;;  %s1460_s1 = inlined_call_operand.vmem [shape: f32[8], index: 1, kind: input, shape index: {}]   ;;  %s1461_s2 = inlined_call_operand.vmem [shape: f32[4], index: 2, kind: input, shape index: {}]   ;;  %s1462_s3 = inlined_call_operand.vmem [shape: f32[32], index: 3, kind: input, shape index: {}]   ;;  %s1463_s4 = inlined_call_operand.vmem [shape: f32[8], index: 4, kind: input, shape index: {}]   ;;  %s1464_s5 = inlined_call_operand.vmem [shape: f32[8], index: 5, kind: input, shape index: {}]   ;;  %s1465_s6 = inlined_call_operand.<no memory space> [shape: f32[1], index: 6, kind: input, shape index: {}]   ;;  %s1466_s7 = inlined_call_operand.hbm [shape: f32[16,128], index: 7, kind: output, shape index: {}]  }
   0x1   :  { %1467 = sst [smem:[#allocation18_spill]] %s1459_s0 }
   0x2   :  { %1468 = sst [smem:[#allocation19_spill]] %s1460_s1 }
   0x3   :  { %1469 = sst [smem:[#allocation20_spill]] %s1461_s2 }
   0x4   :  { %1470 = sst [smem:[#allocation21_spill]] %s1462_s3 }
   0x5   :  { %1471 = sst [smem:[#allocation22_spill]] %s1463_s4 }
   0x6   :  { %12 = sst [smem:[#allocation2]] %s1465_s6 }
   0x7   :  { %13 = vsyncpa [#allocation6], 0 }
   0x8   :  { %14 = vsyncpa [#allocation8], 0 }
   0x9   :  { %15 = vsyncpa [#allocation11], 0 }
   0xa   :  { %16 = vsyncpa [#allocation5], 0 }
   0xb   :  { %18 = vsyncpa [#allocation5 + $0x1], 0  ;;  %s1113_s26 = smov 0   ;;  %s1115_s27 = smov 0  }
   0xc   :  { %s1117_s28 = smov 0   ;;  %s1119_s29 = smov 0  }
   0xd LB: > { %s1134_s6 = sadd.s32 4294967295, %s1063_s29   ;;  %s746_s30 = sadd.s32 4294967294, %s1063_s29   ;;  %s1063_s29 = sphi %s1119_s29, %s1485_s29   ;;  %s1059_s28 = sphi %s1117_s28, %s1484_s28   ;;  %s1055_s27 = sphi %s1115_s27, %s1483_s27   ;;  %s1051_s26 = sphi %s1113_s26, %s1482_s26  }
   0xe   : > { %s1138_s8 = sadd.s32 1, %s1063_s29   ;;  %s31_s9 = sadd.s32 1, %s1059_s28 }
   0xf   : > { %s28_s10 = ssub.s32 %s1063_s29, %s1138_s8  ;;  %p38_p0 = scmp.ne.s32.totalorder %s1059_s28, %s1055_s27 }
  0x10   : > { %p29_p1 = scmp.eq.s32.totalorder %s28_s10, 0  ;;  %p39_p2 = scmp.eq.s32.totalorder %s1063_s29, 0 }
  0x11   : > { %p194_p3 = scmp.eq.s32.totalorder %s1134_s6, 1  ;;  %p199_p4 = scmp.ne.s32.totalorder %s1055_s27, %s1051_s26 }
  0x12   : > { %s1150_s11 = scalar_select %p29_p1, %s1059_s28, %s31_s9  }
  0x13   : > { %p1152_p5 = por %p39_p2, %p38_p0  ;;  %p1156_p6 = por %p194_p3, %p38_p0 }
  0x14   : > { %p200_p7 = scmp.eq.s32.totalorder %s746_s30, 1  ;;  %p747_p8 = scmp.ge.s32.totalorder %s1063_s29, 1 }
  0x15   : > { %p207_p9 = scmp.lt.s32.totalorder %s1063_s29, 3  ;;  %p866_p11 = scmp.eq.s32.totalorder %s1134_s6, 0 }
  0x16   : > { %p1162_p10 = por %p200_p7, %p199_p4  ;;  %s1476_s2 = sld [smem:[#allocation20_spill]] }
  0x17   : > { %p1167_p12 = pnand %p747_p8, %p207_p9  ;;  %s1477_s4 = sld [smem:[#allocation22_spill]] }
  0x18   : > { %s1479_s1 = sld [smem:[#allocation19_spill]]  ;;  %s1065_s16 = smov [#allocation7]  }
  0x19   : > { %p846_p13 = pneg %p1167_p12  ;;  %s1480_s3 = sld [smem:[#allocation21_spill]] }
  0x1a   : > { %s1066_s17 = smov [#allocation10]   ;;  %s1067_s19 = smov [#allocation4]  }
  0x1b   : > { %p1181_p0 = pnand %p866_p11, %p846_p13  ;;  %s1068_s20 = smov [#allocation9]  }
  0x1c   : > { %s229_s18 = sshll.u32 %s1476_s2, 4  ;;  %s1069_s30 = smov [#allocation12]   ;;  %s230_s18 = int_to_ptr.vmem [resolvable:$true] %s229_s18 }
  0x1d   : > { %s249_s21 = sshll.u32 %s1477_s4, 4  ;;  %p753_p1 = scmp.ge.s32.totalorder %s1063_s29, 2  ;;  %s250_s21 = int_to_ptr.vmem [resolvable:$true] %s249_s21 }
  0x1e   : > { %s219_s25 = sshll.u32 %s1479_s1, 4  ;;  %s259_s1 = sshll.u32 %s1464_s5, 4  ;;  %s220_s25 = int_to_ptr.vmem [resolvable:$true] %s219_s25  ;;  %s260_s1 = int_to_ptr.vmem [resolvable:$true] %s259_s1 }
  0x1f   : > { %s239_s10 = sshll.u32 %s1480_s3, 4  ;;  %s240_s10 = int_to_ptr.vmem [resolvable:$true] %s239_s10 }
  0x20   : > { %852 = dma.vmem_to_smem (!%p1181_p0), %s230_s18, 16, %s1065_s16, [#allocation8]  }
  0x21   : > { %858 = dma.vmem_to_smem (!%p1181_p0), %s250_s21, 16, %s1066_s17, [#allocation11]  }
  0x22   : > { %849 = dma.vmem_to_smem (!%p1181_p0), %s220_s25, 16, %s1067_s19, [#allocation6]  }
  0x23   : > { %855 = dma.vmem_to_smem (!%p1181_p0), %s240_s10, 16, %s1068_s20, [#allocation8]  }
  0x24   : > { %861 = dma.vmem_to_smem (!%p1181_p0), %s260_s1, 16, %s1069_s30, [#allocation11]  }
  0x25   : > { %269 = sbr.rel (%p753_p1) target bundleno = 54 (0x36), region = 40 }
  0x2a   : > { %272 = sbr.rel (!%p1152_p5) target bundleno = 54 (0x36), region = 44  ;;  %s274_s18 = sand.u32 (%p1152_p5), 1, %s1059_s28  }
  0x2b   : > { %s755_s21 = sshll.u32 (%p1152_p5), %s1063_s29, 3  ;;  %s754_s25 = sshll.u32 (%p1152_p5), %s274_s18, 4 }
  0x2c   : > { %s1481_s0 = sld [smem:[#allocation18_spill]] (%p1152_p5)  ;;  %s276_s1 = scalar_lea.vmem (%p1152_p5), [#allocation3], %s754_s25 }
  0x32   : > { %s278_s16 = scalar_lea.vmem %s1481_s0, %s755_s21 }
  0x33   : > { %v309_v0 = vld [vmem:[%s278_s16] sm:$0xff]  ;;  %v311_v1 = vld [vmem:[%s278_s16 + $0x10] sm:$0xff] }
  0x34   : > { %310 = vst [vmem:[%s276_s1] sm:$0xff] %v309_v0 }
  0x35   : > { %312 = vst [vmem:[%s276_s1 + $0x8] sm:$0xff] %v311_v1 }
  0x36 PF: > { %321 = sbr.rel (%p1167_p12) target bundleno = 146 (0x92), region = 82  ;;  %s1217_s12 = sand.u32 (!%p1167_p12), 1, %s1055_s27  }
  0x37   : > { %s757_s22 = sshll.u32 (!%p1167_p12), %s1217_s12, 4 }
  0x38   : > { %s326_s17 = scalar_lea.vmem (!%p1167_p12), [#allocation3], %s757_s22 }
  0x3b   : > { %1034 = dma.done.wait (%p866_p11), [#allocation6], 16  }
  0x3c   : > { %1036 = vsyncadd (%p866_p11), [#allocation6], 4294967280 }
  0x3d   : > { %1038 = dma.done.wait (%p866_p11), [#allocation8], 32  }
  0x3e   : > { %1040 = vsyncadd (%p866_p11), [#allocation8], 4294967264 }
  0x3f   : > { %1042 = dma.done.wait (%p866_p11), [#allocation11], 32  }
  0x40   : > { %1044 = vsyncadd (%p866_p11), [#allocation11], 4294967264 }
  0x41   : > { %355 = sfence }
  0x42   : > { %s384_s15 = sld [smem:[#allocation4]]  ;;  %v381_v2 = vld [vmem:[%s326_s17] sm:$0xff]  ;;  %v764_v3 = vld [vmem:[%s326_s17 + $0x8] sm:$0xff] }
  0x43   : > { %s765_s19 = sld [smem:[#allocation4 + $0x4]] }
  0x44   : > { %s1232_s20 = sld [smem:[#allocation7]] }
  0x45   : > { %s766_s23 = sld [smem:[#allocation4 + $0x1]] }
  0x46   : > { %s767_s24 = sld [smem:[#allocation4 + $0x5]] }
  0x47   : > { %s1234_s30 = sld [smem:[#allocation7 + $0x1]] }
  0x48   : > { %s769_s18 = sld [smem:[#allocation4 + $0x2]]  ;;  %v385_v4 = vstv %s384_s15 }
  0x49   : > { %s770_s21 = sld [smem:[#allocation4 + $0x6]]  ;;  %v388_v5 = vstv %s765_s19  ;;  %v386_v6 = vmul.f32 %v385_v4, %v381_v2 }
  0x4a   : > { %s1236_s25 = sld [smem:[#allocation7 + $0x2]]  ;;  %v389_v7 = vmul.f32 %v764_v3, %v388_v5  ;;  %v392_v13 = vstv %s1232_s20 }
  0x4b   : > { %s1238_s9 = sld [smem:[#allocation4 + $0x3]]  ;;  %v396_v8 = vstv %s766_s23 }
  0x4c   : > { %s1240_s10 = sld [smem:[#allocation4 + $0x7]]  ;;  %v399_v9 = vstv %s767_s24  ;;  %v390_v10 = vadd.f32 %v389_v7, %v386_v6  ;;  %v397_v11 = vmul.f32 %v396_v8, %v381_v2 }
  0x4d   : > { %s1242_s16 = sld [smem:[#allocation7 + $0x3]]  ;;  %v400_v12 = vmul.f32 %v764_v3, %v399_v9  ;;  %v403_v20 = vstv %s1234_s30 }
  0x4e   : > { %s1244_s1 = sld [smem:[#allocation9]]  ;;  %v407_v14 = vstv %s769_s18  ;;  %v393_v16 = vadd.f32 %v392_v13, %v390_v10 }
  0x4f   : > { %s1246_s22 = sld [smem:[#allocation10]]  ;;  %v410_v15 = vstv %s770_s21  ;;  %v401_v17 = vadd.f32 %v400_v12, %v397_v11  ;;  %v408_v18 = vmul.f32 %v407_v14, %v381_v2 }
  0x50   : > { %s1248_s0 = sld [smem:[#allocation9 + $0x8]]  ;;  %v411_v19 = vmul.f32 %v764_v3, %v410_v15  ;;  %v1272_v23 = vmax.f32 %v393_v16, 0.0  ;;  %v414_v26 = vstv %s1236_s25 }
  0x51   : > { %s1250_s17 = sld [smem:[#allocation9 + $0x10]]  ;;  %v418_v21 = vstv %s1238_s9  ;;  %v404_v24 = vadd.f32 %v403_v20, %v401_v17 }
  0x52   : > { %s1252_s15 = sld [smem:[#allocation9 + $0x18]]  ;;  %v421_v22 = vstv %s1240_s10  ;;  %v412_v25 = vadd.f32 %v411_v19, %v408_v18  ;;  %v419_v27 = vmul.f32 %v418_v21, %v381_v2 }
  0x53   : > { %s1255_s19 = sld [smem:[#allocation9 + $0x1]]  ;;  %v422_v28 = vmul.f32 %v764_v3, %v421_v22  ;;  %v1285_v31 = vmax.f32 %v404_v24, 0.0  ;;  %v425_v37 = vstv %s1242_s16 }
  0x54   : > { %s1257_s23 = sld [smem:[#allocation10 + $0x1]]  ;;  %v429_v29 = vstv %s1244_s1  ;;  %v415_v32 = vadd.f32 %v414_v26, %v412_v25 }
  0x55   : > { %s1259_s24 = sld [smem:[#allocation9 + $0x9]]  ;;  %v430_v33 = vmul.f32 %v429_v29, %v1272_v23  ;;  %v423_v34 = vadd.f32 %v422_v28, %v419_v27  ;;  %v432_v35 = vstv %s1246_s22 }
  0x56   : > { %s1261_s2 = sld [smem:[#allocation9 + $0x11]]  ;;  %v435_v36 = vstv %s1248_s0  ;;  %v1303_v42 = vmax.f32 %v415_v32, 0.0 }
  0x57   : > { %s1264_s3 = sld [smem:[#allocation9 + $0x19]]  ;;  %v433_v43 = vadd.f32 %v432_v35, %v430_v33  ;;  %v436_v44 = vmul.f32 %v435_v36, %v1285_v31  ;;  %v426_v45 = vadd.f32 %v425_v37, %v423_v34  ;;  %v439_v46 = vstv %s1250_s17 }
  0x58   : > { %s1268_s20 = sld [smem:[#allocation9 + $0x2]]  ;;  %v440_v54 = vmul.f32 %v439_v46, %v1303_v42  ;;  %v443_v57 = vstv %s1252_s15 }
  0x59   : > { %s1270_s18 = sld [smem:[#allocation10 + $0x2]]  ;;  %v448_v30 = vstv %s1255_s19  ;;  %v437_v53 = vadd.f32 %v436_v44, %v433_v43  ;;  %v1324_v56 = vmax.f32 %v426_v45, 0.0 }
  0x5a   : > { %s1274_s21 = sld [smem:[#allocation9 + $0xa]]  ;;  %v449_v38 = vmul.f32 %v448_v30, %v1272_v23  ;;  %v451_v39 = vstv %s1257_s23 }
  0x5b   : > { %s1278_s30 = sld [smem:[#allocation9 + $0x12]]  ;;  %v454_v40 = vstv %s1259_s24  ;;  %v441_v2 = vadd.f32 %v440_v54, %v437_v53  ;;  %v444_v6 = vmul.f32 %v443_v57, %v1324_v56 }
  0x5c   : > { %s1280_s9 = sld [smem:[#allocation9 + $0x1a]]  ;;  %v452_v47 = vadd.f32 %v451_v39, %v449_v38  ;;  %v455_v48 = vmul.f32 %v454_v40, %v1285_v31  ;;  %v458_v49 = vstv %s1261_s2 }
  0x5d   : > { %s1283_s10 = sld [smem:[#allocation9 + $0x3]]  ;;  %v459_v58 = vmul.f32 %v458_v49, %v1303_v42  ;;  %v462_v59 = vstv %s1264_s3  ;;  %v1364_v22 = vadd.f32 %v444_v6, %v441_v2 }
  0x5e   : > { %s1288_s25 = sld [smem:[#allocation10 + $0x3]]  ;;  %v467_v41 = vstv %s1268_s20  ;;  %v456_v60 = vadd.f32 %v455_v48, %v452_v47  ;;  %v463_v7 = vmul.f32 %v462_v59, %v1324_v56 }
  0x5f   : > { %s1292_s1 = sld [smem:[#allocation9 + $0xb]]  ;;  %v468_v50 = vmul.f32 %v467_v41, %v1272_v23  ;;  %v470_v51 = vstv %s1270_s18 }
  0x60   : > { %s1296_s19 = sld [smem:[#allocation9 + $0x13]]  ;;  %v473_v52 = vstv %s1274_s21  ;;  %v460_v10 = vadd.f32 %v459_v58, %v456_v60 }
  0x61   : > { %s1301_s4 = sld [smem:[#allocation9 + $0x1b]]  ;;  %v471_v61 = vadd.f32 %v470_v51, %v468_v50  ;;  %v474_v62 = vmul.f32 %v473_v52, %v1285_v31  ;;  %v477_v0 = vstv %s1278_s30 }
  0x62   : > { %s1306_s0 = sld [smem:[#allocation9 + $0x4]]  ;;  %v478_v12 = vmul.f32 %v477_v0, %v1303_v42  ;;  %v481_v13 = vstv %s1280_s9  ;;  %v1370_v26 = vadd.f32 %v463_v7, %v460_v10  ;;  %v446_v0 = vmax.f32 %v1364_v22, 0.0 }
  0x63   : > { %s1309_s16 = sld [smem:[#allocation10 + $0x4]]  ;;  %v486_v55 = vstv %s1283_s10  ;;  %v475_v11 = vadd.f32 %v474_v62, %v471_v61  ;;  %v482_v30 = vmul.f32 %v481_v13, %v1324_v56 }
  0x64   : > { %s1314_s22 = sld [smem:[#allocation9 + $0xc]]  ;;  %v487_v1 = vmul.f32 %v486_v55, %v1272_v23  ;;  %v489_v3 = vstv %s1288_s25 }
  0x65   : > { %s1318_s23 = sld [smem:[#allocation9 + $0x14]]  ;;  %v492_v4 = vstv %s1292_s1  ;;  %v479_v35 = vadd.f32 %v478_v12, %v475_v11 }
  0x66   : > { %s1322_s17 = sld [smem:[#allocation9 + $0x1c]]  ;;  %v490_v14 = vadd.f32 %v489_v3, %v487_v1  ;;  %v493_v15 = vmul.f32 %v492_v4, %v1285_v31  ;;  %v496_v16 = vstv %s1296_s19  ;;  %v465_v1 = vmax.f32 %v1370_v26, 0.0 }
  0x67   : > { %s1329_s2 = sld [smem:[#allocation9 + $0x5]]  ;;  %v500_v27 = vstv %s1301_s4  ;;  %v497_v33 = vmul.f32 %v496_v16, %v1303_v42  ;;  %v483_v52 = vadd.f32 %v482_v30, %v479_v35 }
  0x68   : > { %v505_v63 = vstv %s1306_s0  ;;  %s1333_s24 = sld [smem:[#allocation10 + $0x5]]  ;;  %v494_v32 = vadd.f32 %v493_v15, %v490_v14  ;;  %v501_v39 = vmul.f32 %v500_v27, %v1324_v56 }
  0x69   : > { %s1337_s20 = sld [smem:[#allocation9 + $0xd]]  ;;  %v506_v5 = vmul.f32 %v505_v63, %v1272_v23  ;;  %v508_v8 = vstv %s1309_s16  ;;  %v484_v11 = vmax.f32 %v483_v52, 0.0 }
  0x6a   : > { %s1342_s3 = sld [smem:[#allocation9 + $0x15]]  ;;  %v511_v9 = vstv %s1314_s22  ;;  %v498_v48 = vadd.f32 %v497_v33, %v494_v32 }
  0x6b   : > { %s1348_s15 = sld [smem:[#allocation9 + $0x1d]]  ;;  %v509_v18 = vadd.f32 %v508_v8, %v506_v5  ;;  %v512_v19 = vmul.f32 %v511_v9, %v1285_v31  ;;  %v515_v24 = vstv %s1318_s23 }
  0x6c   : > { %s1352_s18 = sld [smem:[#allocation9 + $0x6]]  ;;  %v516_v37 = vmul.f32 %v515_v24, %v1303_v42  ;;  %v519_v40 = vstv %s1322_s17  ;;  %v502_v2 = vadd.f32 %v501_v39, %v498_v48 }
  0x6d   : > { %v524_v17 = vstv %s1329_s2  ;;  %s1357_s21 = sld [smem:[#allocation10 + $0x6]]  ;;  %v513_v36 = vadd.f32 %v512_v19, %v509_v18  ;;  %v520_v54 = vmul.f32 %v519_v40, %v1324_v56 }
  0x6e   : > { %v525_v20 = vmul.f32 %v524_v17, %v1272_v23  ;;  %v527_v21 = vstv %s1333_s24  ;;  %s1362_s30 = sld [smem:[#allocation9 + $0xe]]  ;;  %v503_v15 = vmax.f32 %v502_v2, 0.0 }
  0x6f   : > { %v530_v25 = vstv %s1337_s20  ;;  %s1368_s9 = sld [smem:[#allocation9 + $0x16]]  ;;  %v517_v53 = vadd.f32 %v516_v37, %v513_v36 }
  0x70   : > { %v528_v28 = vadd.f32 %v527_v21, %v525_v20  ;;  %v531_v29 = vmul.f32 %v530_v25, %v1285_v31  ;;  %s1374_s10 = sld [smem:[#allocation9 + $0x1e]]  ;;  %v534_v34 = vstv %s1342_s3 }
  0x71   : > { %s1379_s25 = sld [smem:[#allocation9 + $0x7]]  ;;  %v535_v45 = vmul.f32 %v534_v34, %v1303_v42  ;;  %v538_v46 = vstv %s1348_s15  ;;  %v521_v4 = vadd.f32 %v520_v54, %v517_v53 }
  0x72   : > { %v543_v38 = vstv %s1352_s18  ;;  %s1383_s4 = sld [smem:[#allocation10 + $0x7]]  ;;  %v532_v44 = vadd.f32 %v531_v29, %v528_v28  ;;  %v539_v55 = vmul.f32 %v538_v46, %v1324_v56  ;;  %s763_s18 = sshll.u32 %s1217_s12, 3 }
  0x73   : > { %v544_v41 = vmul.f32 %v543_v38, %v1272_v23  ;;  %v546_v43 = vstv %s1357_s21  ;;  %s1389_s1 = sld [smem:[#allocation9 + $0xf]]  ;;  %v522_v18 = vmax.f32 %v521_v4, 0.0  ;;  %s821_s21 = sshll.u32 %s1134_s6, 3 }
  0x74   : > { %v549_v47 = vstv %s1362_s30  ;;  %s1394_s19 = sld [smem:[#allocation9 + $0x17]]  ;;  %v536_v60 = vadd.f32 %v535_v45, %v532_v44  ;;  %s616_s6 = scalar_lea.sflag [#allocation5], %s1217_s12 }
  0x75   : > { %v547_v49 = vadd.f32 %v546_v43, %v544_v41  ;;  %v550_v50 = vmul.f32 %v549_v47, %v1285_v31  ;;  %v553_v51 = vstv %s1368_s9  ;;  %s1398_s0 = sld [smem:[#allocation9 + $0x1f]] }
  0x76   : > { %s1401_s16 = sld [smem:[#allocation12]]  ;;  %v554_v58 = vmul.f32 %v553_v51, %v1303_v42  ;;  %v557_v61 = vstv %s1374_s10  ;;  %v540_v12 = vadd.f32 %v539_v55, %v536_v60  ;;  %s626_s10 = scalar_lea.hbm %s1466_s7, %s821_s21 }
  0x77   : > { %v551_v57 = vadd.f32 %v550_v50, %v547_v49  ;;  %v562_v59 = vstv %s1379_s25  ;;  %s1406_s22 = sld [smem:[#allocation2]]  ;;  %v558_v8 = vmul.f32 %v557_v61, %v1324_v56  ;;  %s380_s25 = scalar_lea.vmem [#allocation13], %s763_s18 }
  0x78   : > { %v563_v62 = vmul.f32 %v562_v59, %v1272_v23  ;;  %v565_v63 = vstv %s1383_s4  ;;  %s1411_s23 = sld [smem:[#allocation12 + $0x1]]  ;;  %v541_v25 = vmax.f32 %v540_v12, 0.0  ;;  %s628_s4 = sshll.u32 %s380_s25, 4  ;;  %s629_s4 = int_to_ptr.vmem [resolvable:$true] %s628_s4 }
  0x79   : > { %v568_v3 = vstv %s1389_s1  ;;  %s814_s17 = sld [smem:[#allocation12 + $0x2]]  ;;  %v555_v23 = vadd.f32 %v554_v58, %v551_v57  ;;  %s630_s1 = sshll.u32 %s626_s10, 4  ;;  %s631_s1 = int_to_ptr.hbm [resolvable:$true] %s630_s1 }
  0x7a   : > { %v566_v5 = vadd.f32 %v565_v63, %v563_v62  ;;  %v569_v6 = vmul.f32 %v568_v3, %v1285_v31  ;;  %v572_v7 = vstv %s1394_s19  ;;  %s815_s2 = sld [smem:[#allocation12 + $0x3]]  ;;  %s1003_s19 = sshra.s32 %s631_s1, 4  ;;  %s1004_s19 = int_to_ptr.hbm [resolvable:$true] %s1003_s19 }
  0x7b   : > { %v573_v9 = vmul.f32 %v572_v7, %v1303_v42  ;;  %v576_v10 = vstv %s1398_s0  ;;  %s816_s24 = sld [smem:[#allocation12 + $0x4]]  ;;  %v559_v21 = vadd.f32 %v558_v8, %v555_v23  ;;  %s1005_s0 = scalar_lea.hbm %s1004_s19, 8 }
  0x7c   : > { %v570_v13 = vadd.f32 %v569_v6, %v566_v5  ;;  %v581_v14 = vstv %s1401_s16  ;;  %s817_s20 = sld [smem:[#allocation12 + $0x5]]  ;;  %v577_v16 = vmul.f32 %v576_v10, %v1324_v56  ;;  %p1006_p2 = scmp.ne.s32.totalorder %s1004_s19, %s1005_s0 }
  0x7d   : > { %v582_v31 = vmul.f32 %v581_v14, %v446_v0  ;;  %v584_v17 = vstv %s1406_s22  ;;  %s818_s3 = sld [smem:[#allocation12 + $0x6]]  ;;  %v560_v33 = vmax.f32 %v559_v21, 0.0  ;;  %p1010_p5 = scmp.lt.s32.totalorder %s1004_s19, %s1466_s7 }
  0x7e   : > { %v574_v19 = vadd.f32 %v573_v9, %v570_v13  ;;  %v587_v20 = vstv %s1411_s23  ;;  %s819_s15 = sld [smem:[#allocation12 + $0x7]]  ;;  %p1007_p3 = pnand %p1006_p2, %p1156_p6 }
  0x7f   : > { %v585_v42 = vadd.f32 %v584_v17, %v582_v31  ;;  %v588_v22 = vmul.f32 %v587_v20, %v465_v1  ;;  %v591_v24 = vstv %s814_s17  ;;  %s1009_s23 = scalar_lea.hbm %s1466_s7, 16 }
  0x80   : > { %v592_v26 = vmul.f32 %v591_v24, %v484_v11  ;;  %v595_v27 = vstv %s815_s2  ;;  %v578_v28 = vadd.f32 %v577_v16, %v574_v19  ;;  %p1008_p4 = pneg %p1007_p3  ;;  %p1011_p7 = scmp.lt.s32.totalorder %s1009_s23, %s1005_s0 }
  0x81   : > { %v589_v29 = vadd.f32 %v588_v22, %v585_v42  ;;  %v596_v30 = vmul.f32 %v595_v27, %v503_v15  ;;  %v599_v56 = vstv %s816_s24 }
  0x82   : > { %v603_v32 = vstv %s817_s20  ;;  %v600_v35 = vmul.f32 %v599_v56, %v522_v18  ;;  %v579_v37 = vmax.f32 %v578_v28, 0.0  ;;  %p1012_p8 = por %p1011_p7, %p1010_p5 }
  0x83   : > { %v593_v34 = vadd.f32 %v592_v26, %v589_v29  ;;  %v607_v36 = vstv %s818_s3  ;;  %v604_v39 = vmul.f32 %v603_v32, %v541_v25 }
  0x84   : > { %v611_v40 = vstv %s819_s15  ;;  %v608_v43 = vmul.f32 %v607_v36, %v560_v33  ;;  %p1013_p9 = pnand %p1012_p8, %p1008_p4 }
  0x85   : > { %v597_v38 = vadd.f32 %v596_v30, %v593_v34  ;;  %v612_v45 = vmul.f32 %v611_v40, %v579_v37 }
  0x87   : > { %v601_v41 = vadd.f32 %v600_v35, %v597_v38 }
  0x89   : > { %v605_v44 = vadd.f32 %v604_v39, %v601_v41 }
  0x8b   : > { %v609_v46 = vadd.f32 %v608_v43, %v605_v44 }
  0x8d   : > { %v613_v47 = vadd.f32 %v612_v45, %v609_v46 }
  0x8f   : > { %614 = vst [vmem:[%s380_s25] sm:$0xff] %v613_v47 }
  0x90   : > { %1016 = shalt.err (!%p1013_p9)
}
  0x91   : > { %844 = dma.vmem_to_hbm [thread:$0]  (%p1156_p6), %s629_s4, 128, %s631_s1, %s616_s6  }
  0x92 PF: > { %s642_s12 = sand.u32 1, %s1051_s26   ;;  %p863_p11 = pnand %p753_p1, %p1162_p10 }
  0x93   : > { %s643_s24 = scalar_lea.sflag [#allocation5], %s642_s12 }
  0x94   : > { %p864_p12 = pneg %p863_p11 }
  0x96   : > { %1046 = dma.done.wait (%p864_p12), %s643_s24, 128  }
  0x97   : > { %1048 = vsyncadd (%p864_p12), %s643_s24, 4294967168  ;;  %p21_p13 = scmp.ge.s32.totalorder %s1138_s8, 4   ;;  %s1482_s26 = smov %s1055_s27 }
  0x98   : > { %s1483_s27 = smov %s1059_s28  ;;  %s1484_s28 = smov %s1150_s11 }
  0x99   : > { %s1485_s29 = smov %s1138_s8  ;;  %23 = sbr.rel (!%p21_p13) target bundleno = 13 (0xd), region = 148 }
  0x9e   :  { %649 = vsyncpa [#allocation5], 1 }
  0x9f   :  { %651 = vsyncpa [#allocation5 + $0x1], 1 }
  0xa0   :  { %652 = vsyncpa [#allocation6], 1 }
  0xa1   :  { %654 = vsyncpa [#allocation6 + $0x1], 1 }
  0xa2   :  { %655 = vsyncpa [#allocation8], 1 }
  0xa3   :  { %656 = vsyncpa [#allocation11], 1 }

</bundles_post_ra>
